<compile_context>
chip_gen: v6e
topology: v6e:2x2x1
jax: 0.10.0
libtpu: 0.0.40
codegen_flags: <defaults>
</compile_context>

<pallas_src>
import jax
import jax.numpy as jnp
from jax.experimental import pallas as pl
from jax.experimental.pallas import tpu as pltpu


_VMEM_TILE_BUDGET = 24 * 1024 * 1024   # bytes reserved for the kernel's tiles


def _round_up(x, m):
    return ((x + m - 1) // m) * m


def _linear_l2norm_kernel(x_ref, w_ref, b_ref, o_ref):
    # x_ref: (tm, H)  w_ref: (H, Ep)  b_ref: (1, Ep)  o_ref: (tm, Ep)
    # No f32 upcast of the matmul operands; accumulate in f32 on the MXU.
    y = jnp.dot(x_ref[...], w_ref[...], preferred_element_type=jnp.float32)
    y = y + b_ref[...].astype(jnp.float32)
    # F.normalize(p=2, dim=-1) == y / max(||y||_2, 1e-12).  Implemented as
    # y * rsqrt(max(sum(y^2), (1e-12)^2)); eps is applied to the squared norm
    # instead of the norm (behaviorally equivalent, differs only for
    # near-zero rows), trading a per-element divide for a per-row rsqrt.
    sumsq = jnp.sum(y * y, axis=-1, keepdims=True)
    inv = jax.lax.rsqrt(jnp.maximum(sumsq, 1e-24))
    o_ref[...] = (y * inv).astype(o_ref.dtype)


def _choose_tm(H, Ep, x_bytes, w_bytes, o_bytes):
    """Largest row tile whose (double-buffered) tiles fit the VMEM budget."""
    # Weight / bias blocks are grid-invariant but still double-buffered by the
    # default pipeline; account for both copies.
    fixed = 2 * (H * Ep * w_bytes + Ep * 4)
    for tm in (1024, 512, 256, 128, 64, 32, 16, 8):
        if fixed + 2 * tm * (H * x_bytes + Ep * o_bytes) <= _VMEM_TILE_BUDGET:
            return tm
    return 8


def linear_l2norm(x, w, b):
    """x: (M, H), w: (H, E), b: (E,) -> (M, E) with rows L2-normalized."""
    M, H = x.shape
    E = w.shape[1]
    out_dtype = x.dtype
    o_bytes = jnp.dtype(out_dtype).itemsize

    # Pad E up to a multiple of 128 (lane-dense stores).  Zero weight columns
    # and zero bias add nothing to the sum of squares, so normalization of the
    # real columns is unchanged; the padding is sliced off at the end.
    Ep = max(_round_up(E, 128), 128)
    if Ep != E:
        w = jnp.pad(w, ((0, 0), (0, Ep - E)))
        b = jnp.pad(b, (0, Ep - E))
    b2 = b.reshape(1, Ep).astype(jnp.float32)

    tm = _choose_tm(H, Ep, x.dtype.itemsize, w.dtype.itemsize, o_bytes)
    tm = min(tm, _round_up(M, 8))          # don't over-tile tiny inputs
    Mp = _round_up(M, tm)                  # pad M instead of a tm=M fallback
    if Mp != M:
        x = jnp.pad(x, ((0, Mp - M), (0, 0)))

    cost = pl.CostEstimate(
        flops=2 * Mp * H * Ep,
        transcendentals=Mp,                # one rsqrt per row
        bytes_accessed=(Mp * H * x.dtype.itemsize
                        + H * Ep * w.dtype.itemsize
                        + Ep * 4
                        + Mp * Ep * o_bytes),
    )

    out = pl.pallas_call(
        _linear_l2norm_kernel,
        out_shape=jax.ShapeDtypeStruct((Mp, Ep), out_dtype),
        grid_spec=pl.GridSpec(
            grid=(Mp // tm,),
            in_specs=[
                pl.BlockSpec((tm, H), lambda i: (i, 0)),
                pl.BlockSpec((H, Ep), lambda i: (0, 0)),   # grid-invariant W
                pl.BlockSpec((1, Ep), lambda i: (0, 0)),   # grid-invariant b
            ],
            out_specs=pl.BlockSpec((tm, Ep), lambda i: (i, 0)),
        ),
        compiler_params=pltpu.CompilerParams(
            dimension_semantics=("parallel",),   # megacore / 2-TC sharding
            vmem_limit_bytes=32 * 1024 * 1024,
        ),
        cost_estimate=cost,
    )(x, w, b2)

    return out[:M, :E]


def encoder_text_forward(last_hidden_state, pooler_output, params):
    """Replicates EncoderText.forward given the BERT outputs.

    last_hidden_state: (B, L, H);  pooler_output: (B, H)
    returns (stc_emb (B, E), wrd_emb (B, L, E))
    """
    B, L, H = last_hidden_state.shape
    E = params["fc_w"].shape[1]

    # Word path: the big (B*L, H) @ (H, E) GEMM + normalize -> Pallas kernel.
    wrd = linear_l2norm(last_hidden_state.reshape(B * L, H),
                        params["fc_w"], params["fc_b"])
    wrd_emb = wrd.reshape(B, L, E)

    # Sentence path: only B rows.  A dedicated kernel launch (+ weight DMA)
    # is pure overhead for this size, so the tiny linear+normalize stays in jnp.
    y = (pooler_output @ params["fc_stc_w"] + params["fc_stc_b"]).astype(jnp.float32)
    norm = jnp.sqrt(jnp.sum(y * y, axis=-1, keepdims=True))
    stc_emb = (y / jnp.maximum(norm, 1e-12)).astype(pooler_output.dtype)

    return stc_emb, wrd_emb


def init_params(key, bert_hid, embed_size):
    """nn.Linear-style init: U(-k, k), k = 1/sqrt(fan_in)."""
    k = 1.0 / jnp.sqrt(jnp.float32(bert_hid))
    k1, k2, k3, k4 = jax.random.split(key, 4)
    return {
        "fc_w": jax.random.uniform(k1, (bert_hid, embed_size), jnp.float32, -k, k),
        "fc_b": jax.random.uniform(k2, (embed_size,), jnp.float32, -k, k),
        "fc_stc_w": jax.random.uniform(k3, (bert_hid, embed_size), jnp.float32, -k, k),
        "fc_stc_b": jax.random.uniform(k4, (embed_size,), jnp.float32, -k, k),
    }


def _ref_lin_norm(x, w, b):
    y = x @ w + b
    n = jnp.sqrt(jnp.sum(y * y, axis=-1, keepdims=True))
    return y / jnp.maximum(n, 1e-12)


if __name__ == "__main__":
    # Small synthetic shapes: batch=2, seq=8, bert_hid=32, embed_size=32.
    B, L, H, E = 2, 8, 32, 32
    key = jax.random.PRNGKey(0)
    k_params, k_hidden, k_pool, k_big = jax.random.split(key, 4)

    params = init_params(k_params, H, E)
    # Synthetic BERT outputs (stand-ins for results.last_hidden_state /
    # results.pooler_output).
    last_hidden_state = jax.random.normal(k_hidden, (B, L, H), jnp.float32)
    pooler_output = jax.random.normal(k_pool, (B, H), jnp.float32)

    stc_emb, wrd_emb = encoder_text_forward(last_hidden_state, pooler_output, params)
    jax.block_until_ready((stc_emb, wrd_emb))

    wrd_ref = _ref_lin_norm(last_hidden_state.reshape(B * L, H),
                            params["fc_w"], params["fc_b"]).reshape(B, L, E)
    stc_ref = _ref_lin_norm(pooler_output, params["fc_stc_w"], params["fc_stc_b"])
    assert wrd_emb.shape == (B, L, E) and stc_emb.shape == (B, E)
    assert jnp.allclose(wrd_emb, wrd_ref, atol=1e-4, rtol=1e-4)
    assert jnp.allclose(stc_emb, stc_ref, atol=1e-4, rtol=1e-4)

    # Extra check exercising the tiled path: multi-block grid with M padding
    # (2560 rows -> 3 x 1024-row blocks) and E padding (200 -> 256 lanes).
    M2, H2, E2 = 2560, 128, 200
    kx, kw, kb = jax.random.split(k_big, 3)
    x2 = jax.random.normal(kx, (M2, H2), jnp.float32)
    w2 = jax.random.normal(kw, (H2, E2), jnp.float32) * 0.05
    bb = jax.random.normal(kb, (E2,), jnp.float32) * 0.05
    out2 = linear_l2norm(x2, w2, bb)
    jax.block_until_ready(out2)
    assert jnp.allclose(out2, _ref_lin_norm(x2, w2, bb), atol=1e-4, rtol=1e-4)

    print("KERNEL_OK")
</pallas_src>

<mosaic_0001>
module attributes {stable_mosaic.version = 11 : i64} {
  func.func @_linear_l2norm_kernel(%arg0: i32, %arg1: memref<16x32xf32, #tpu.memory_space<vmem>>, %arg2: memref<32x128xf32, #tpu.memory_space<vmem>>, %arg3: memref<1x128xf32, #tpu.memory_space<vmem>>, %arg4: memref<16x128xf32, #tpu.memory_space<vmem>>) attributes {dimension_semantics = [#tpu.dimension_semantics<parallel>], iteration_bounds = array<i64: 1>, scalar_prefetch = 0 : i64, scratch_operands = 0 : i64, tpu.core_type = #tpu.core_type<tc>, window_params = [{transform_indices = @transform_0, window_bounds = array<i64: 16, 32>}, {pipeline_mode = #tpu.pipeline_mode<synchronous>, transform_indices = @transform_1, window_bounds = array<i64: 32, 128>}, {pipeline_mode = #tpu.pipeline_mode<synchronous>, transform_indices = @transform_2, window_bounds = array<i64: 1, 128>}, {transform_indices = @transform_3, window_bounds = array<i64: 16, 128>}]} {
    %c0 = arith.constant 0 : index
    %c0_0 = arith.constant 0 : index
    %0 = vector.load %arg1[%c0, %c0_0] : memref<16x32xf32, #tpu.memory_space<vmem>>, vector<16x32xf32>
    %c0_1 = arith.constant 0 : index
    %c0_2 = arith.constant 0 : index
    %1 = vector.load %arg2[%c0_1, %c0_2] : memref<32x128xf32, #tpu.memory_space<vmem>>, vector<32x128xf32>
    %cst = arith.constant dense<0.000000e+00> : vector<16x128xf32>
    %2 = tpu.matmul %0, %1, %cst {dimension_numbers = #tpu.dot_dimension_numbers<[1], [0], [0], [1], [0, 0, 1, 1], [], []>} : vector<16x32xf32>, vector<32x128xf32>, vector<16x128xf32> -> vector<16x128xf32>
    %c0_3 = arith.constant 0 : index
    %c0_4 = arith.constant 0 : index
    %3 = vector.load %arg3[%c0_3, %c0_4] : memref<1x128xf32, #tpu.memory_space<vmem>>, vector<1x128xf32>
    %4 = vector.broadcast %3 : vector<1x128xf32> to vector<16x128xf32>
    %5 = arith.addf %2, %4 : vector<16x128xf32>
    %6 = arith.mulf %5, %5 : vector<16x128xf32>
    %cst_5 = arith.constant dense<0.000000e+00> : vector<16xf32>
    %7 = vector.multi_reduction <add>, %6, %cst_5 [1] : vector<16x128xf32> to vector<16xf32>
    %8 = vector.shape_cast %7 : vector<16xf32> to vector<16x1xf32>
    %cst_6 = arith.constant 1.000000e-24 : f32
    %9 = vector.broadcast %cst_6 : f32 to vector<16x1xf32>
    %10 = arith.maximumf %8, %9 : vector<16x1xf32>
    %11 = math.rsqrt %10 : vector<16x1xf32>
    %12 = vector.broadcast %11 : vector<16x1xf32> to vector<16x128xf32>
    %13 = arith.mulf %5, %12 : vector<16x128xf32>
    %c0_7 = arith.constant 0 : index
    %c0_8 = arith.constant 0 : index
    %14 = vector.load %arg4[%c0_7, %c0_8] : memref<16x128xf32, #tpu.memory_space<vmem>>, vector<16x128xf32>
    tpu.vector_store %arg4[%c0_7, %c0_8], %13 {strides = array<i32>} : memref<16x128xf32, #tpu.memory_space<vmem>>, vector<16x128xf32>,
    return
  }
  func.func @transform_0(%arg0: i32) -> (i32, i32) {
    %c0_i32 = arith.constant 0 : i32
    %c0_i32_0 = arith.constant 0 : i32
    return %arg0, %c0_i32 : i32, i32
  }
  func.func @transform_1(%arg0: i32) -> (i32, i32) {
    %c0_i32 = arith.constant 0 : i32
    %c0_i32_0 = arith.constant 0 : i32
    %c0_i32_1 = arith.constant 0 : i32
    return %c0_i32, %c0_i32_0 : i32, i32
  }
  func.func @transform_2(%arg0: i32) -> (i32, i32) {
    %c0_i32 = arith.constant 0 : i32
    %c0_i32_0 = arith.constant 0 : i32
    %c0_i32_1 = arith.constant 0 : i32
    return %c0_i32, %c0_i32_0 : i32, i32
  }
  func.func @transform_3(%arg0: i32) -> (i32, i32) {
    %c0_i32 = arith.constant 0 : i32
    %c0_i32_0 = arith.constant 0 : i32
    return %arg0, %c0_i32 : i32, i32
  }
}

</mosaic_0001>

<bundles_post_ra>
// kernel: tpu_custom_call.1
= control target key start
LH: loop header
LB: loop body
LE: loop exit
PB: predicated region body
PF: predicated region fallthrough
CT: control target
= control target key end

     0   :  { %8 = vsyncpa [#allocation3], 0  ;;  %s313_s0 = inlined_call_operand.hbm [shape: f32[16,32], index: 0, kind: input, shape index: {}]   ;;  %s314_s1 = inlined_call_operand.hbm [shape: f32[32,128], index: 1, kind: input, shape index: {}]   ;;  %s315_s2 = inlined_call_operand.vmem [shape: f32[1,128], index: 2, kind: input, shape index: {}]   ;;  %s316_s3 = inlined_call_operand.hbm [shape: f32[16,128], index: 3, kind: output, shape index: {}]  }
   0x1   :  { %9 = vsyncpa [#allocation6], 0 }
   0x2   :  { %10 = vsyncpa [#allocation4], 0  ;;  %s265_s12 = smov [#allocation2]  }
   0x3   :  { %s16_s13 = sshll.u32 %s265_s12, 4  ;;  %s17_s13 = int_to_ptr.vmem [resolvable:$true] %s16_s13 }
   0x4   :  { %s207_s14 = scalar_lea.vmem %s17_s13, 256  ;;  %p212_p1 = scmp.lt.s32.totalorder %s17_s13, %s17_s13 }
   0x5   :  { %p208_p0 = scmp.ne.s32.totalorder %s17_s13, %s207_s14  ;;  %p213_p2 = scmp.lt.s32.totalorder %s207_s14, %s207_s14 }
   0x7   :  { %p214_p3 = por %p213_p2, %p212_p1 }
   0x9   :  { %p215_p4 = pnand %p214_p3, %p208_p0 }
   0xb   :  { %218 = shalt.err (!%p215_p4)
}
   0xc   :  { %s266_s15 = smov 128   ;;  %s267_s16 = smov 8  }
   0xd   :  { %22 = dma.hbm_to_vmem [thread:$0]  %s313_s0, 256, %s17_s13, [#allocation3], %s266_s15, %s266_s15, %s267_s16  }
   0xe   :  { %s268_s19 = smov [#allocation5]  }
   0xf   :  { %s28_s20 = sshll.u32 %s268_s19, 4  ;;  %s29_s20 = int_to_ptr.vmem [resolvable:$true] %s28_s20 }
  0x10   :  { %s227_s21 = scalar_lea.vmem %s29_s20, 512  ;;  %p232_p6 = scmp.lt.s32.totalorder %s29_s20, %s29_s20 }
  0x11   :  { %p228_p5 = scmp.ne.s32.totalorder %s29_s20, %s227_s21  ;;  %p233_p7 = scmp.lt.s32.totalorder %s227_s21, %s227_s21 }
  0x13   :  { %p234_p8 = por %p233_p7, %p232_p6 }
  0x15   :  { %p235_p9 = pnand %p234_p8, %p228_p5 }
  0x17   :  { %238 = shalt.err (!%p235_p9)
}
  0x18   :  { %34 = dma.hbm_to_vmem [thread:$0]  %s314_s1, 512, %s29_s20, [#allocation6], %s266_s15, %s266_s15, %s267_s16  }
  0x19   :  { %259 = dma.done.wait [#allocation3], 256  }
  0x1a   :  { %260 = vsyncadd [#allocation3], 4294967040 }
  0x1b   :  { %261 = dma.done.wait [#allocation6], 512  }
  0x1c   :  { %262 = vsyncadd [#allocation6], 4294966784  ;;  %vm56_vm0 = vcmask 261120   ;;  %v48_v0 = vld [vmem:[#allocation5 + $0x18] sm:$0xff]  ;;  %v47_v1 = vld [vmem:[#allocation5 + $0x10] sm:$0xff]  ;;  %s269_s24 = smov [#allocation7]  }
  0x1d   :  { %179 = vmatprep.subr.mxu0 %v48_v0  ;;  %v43_v2 = vld [vmem:[#allocation2] sm:$0xff]  ;;  %v46_v3 = vld [vmem:[#allocation5 + $0x8] sm:$0xff]  ;;  %v45_v4 = vld [vmem:[#allocation5] sm:$0xff]  ;;  %s157_s25 = sshll.u32 %s269_s24, 4  ;;  %s158_s25 = int_to_ptr.vmem [resolvable:$true] %s157_s25 }
  0x1e   :  { %180 = vmatpush3.msra.mxu0 %v48_v0  ;;  %187 = vmatprep.mubr.msk.f32.mxu0 %vm56_vm0, %v43_v2  ;;  %v44_v5 = vld [vmem:[#allocation2 + $0x8] sm:$0xff]  ;;  %v170_v7 = vld [vmem:[%s315_s2] ss:$0 sm:$0xff]  ;;  %s239_s2 = scalar_lea.vmem %s158_s25, 256  ;;  %p244_p11 = scmp.lt.s32.totalorder %s158_s25, %s158_s25 }
  0x1f   :  { %181 = vmatprep.subr.mxu0 %v47_v1  ;;  %p240_p10 = scmp.ne.s32.totalorder %s158_s25, %s239_s2  ;;  %p245_p12 = scmp.lt.s32.totalorder %s239_s2, %s239_s2 }
  0x20   :  { %182 = vmatpush3.msra.mxu0 %v47_v1 }
  0x21   :  { %183 = vmatprep.subr.mxu0 %v46_v3  ;;  %p246_p13 = por %p245_p12, %p244_p11 }
  0x22   :  { %184 = vmatpush3.msra.mxu0 %v46_v3 }
  0x23   :  { %185 = vmatprep.subr.mxu0 %v45_v4  ;;  %p247_p0 = pnand %p246_p13, %p240_p10 }
  0x24   :  { %186 = vmatpush3.msra.mxu0 %v45_v4 }
  0x25   :  { %188 = vmatmul.mubr.msk.f32.vlgmr.msra.gmra.mxu0 %vm56_vm0, %v44_v5 }
  0xe5   :  { %v189_v6 = vpop.f32.mrf.mxu0 }
  0xe6   :  { %v135_v10 = vadd.f32 %v189_v6, %v170_v7 }
  0xe7   :  { %v129_v8 = vpop.f32.mrf.mxu0 }
  0xe8   :  { %v130_v9 = vadd.f32 %v170_v7, %v129_v8  ;;  %v139_v12 = vmul.f32 %v135_v10, %v135_v10 }
  0xea   :  { %v138_v11 = vmul.f32 %v130_v9, %v130_v9 }
  0xec   :  { %140 = vadd.xlane.f32.xlu0 %v138_v11 }
  0xf0   :  { %142 = vadd.xlane.f32.xlu0 %v139_v12 }
 0x175   :  { %v141_v13 = vpop.xlane.xlu0 %140 }
 0x176   :  { %v144_v14 = vmax.f32 %v141_v13, 1e-24 }
 0x178   :  { %195 = vrsqrt.f32 %v144_v14 }
 0x179   :  { %v143_v15 = vpop.xlane.xlu0 %142 }
 0x17a   :  { %v145_v16 = vmax.f32 %v143_v15, 1e-24 }
 0x17c   :  { %197 = vrsqrt.f32 %v145_v16 }
 0x185   :  { %v196_v17 = vpop.eup %195 }
 0x186   :  { %v148_v18 = vmul.f32 %v196_v17, %v130_v9 }
 0x188   :  { %150 = vst [vmem:[#allocation7] sm:$0xff] %v148_v18 }
 0x189   :  { %v198_v19 = vpop.eup %197 }
 0x18a   :  { %v149_v20 = vmul.f32 %v198_v19, %v135_v10 }
 0x18c   :  { %151 = vst [vmem:[#allocation7 + $0x8] sm:$0xff] %v149_v20 }
 0x18d   :  { %250 = shalt.err (!%p247_p0)
}
 0x18e   :  { %163 = dma.vmem_to_hbm [thread:$0]  %s158_s25, 256, %s316_s3, [#allocation4], %s266_s15, %s266_s15, %s267_s16  }
 0x18f   :  { %263 = dma.done.wait [#allocation4], 256  }
 0x190   :  { %264 = vsyncadd [#allocation4], 4294967040 }
 0x191   :  { %167 = vsyncpa [#allocation3], 1 }
 0x192   :  { %168 = vsyncpa [#allocation6], 1 }
 0x193   :  { %169 = vsyncpa [#allocation4], 1 }

</bundles_post_ra>
